<compile_context>
chip_gen: v7x
topology: tpu7x:2x2x1
jax: 0.10.0
libtpu: 0.0.40
codegen_flags: <defaults>
</compile_context>

<pallas_src>
import functools

import jax
import jax.numpy as jnp
from jax.experimental import pallas as pl
from jax.experimental.pallas import tpu as pltpu


def _stn_kernel(theta_ref, bx_ref, by_ref, img_ref, out_ref, *, H, W, C):
    """Separable bilinear grid-sample, one batch element per grid step.

    theta_ref : (N*6,)      f32 SMEM  flattened affine params, indexed by program_id
    bx_ref    : (1, P)      f32 VMEM  base-grid x coords (align_corners=False)
    by_ref    : (1, P)      f32 VMEM  base-grid y coords
    img_ref   : (1, C*H, W) f32 VMEM  current image, channels folded onto sublanes
    out_ref   : (1, C, P)   f32 VMEM  output, spatially flattened (P = H*W)
    """
    P = H * W
    b = pl.program_id(0)

    # affine_grid: [gx, gy]^T = theta @ [x, y, 1]^T
    t00 = theta_ref[6 * b + 0]
    t01 = theta_ref[6 * b + 1]
    t02 = theta_ref[6 * b + 2]
    t10 = theta_ref[6 * b + 3]
    t11 = theta_ref[6 * b + 4]
    t12 = theta_ref[6 * b + 5]

    bx = bx_ref[...]                      # (1, P)
    by = by_ref[...]                      # (1, P)
    gx = t00 * bx + t01 * by + t02        # normalized sample x in [-1, 1]
    gy = t10 * bx + t11 * by + t12        # normalized sample y

    # grid_sample un-normalization (align_corners=False)
    ix = ((gx + 1.0) * W - 1.0) * 0.5     # pixel-space x
    iy = ((gy + 1.0) * H - 1.0) * 0.5     # pixel-space y

    ix0 = jnp.floor(ix)
    iy0 = jnp.floor(iy)
    ix1 = ix0 + 1.0
    iy1 = iy0 + 1.0
    wx1 = ix - ix0
    wx0 = 1.0 - wx1
    wy1 = iy - iy0
    wy0 = 1.0 - wy1

    # Separable sparse sampling matrices (bilinear weight = wy * wx):
    #   Ax[x, p] has <= 2 non-zeros per column p, Ay[y, p] likewise.
    # Out-of-bounds taps get zero weight ('zeros' padding); independent x / y
    # masking multiplies to the combined mask.
    xrow = jax.lax.broadcasted_iota(jnp.int32, (W, P), 0)
    yrow = jax.lax.broadcasted_iota(jnp.int32, (H, P), 0)

    def tap(rows, idxf, w, extent):
        inb = (idxf >= 0.0) & (idxf < extent)
        wq = jnp.where(inb, w, 0.0)                   # (1, P)
        qi = idxf.astype(jnp.int32)                   # (1, P)  (OOB wrap harmless: weight is 0)
        return jnp.where(rows == qi, wq, 0.0)         # (extent, P)

    Ax = tap(xrow, ix0, wx0, W) + tap(xrow, ix1, wx1, W)   # (W, P)
    Ay = tap(yrow, iy0, wy0, H) + tap(yrow, iy1, wy1, H)   # (H, P)

    # MXU: (C*H, W) @ (W, P) -> G[c*H + y, p] = sum_x img[c, y, x] * Ax[x, p]
    img_ch = img_ref[0]                                    # (C*H, W)
    G = jax.lax.dot_general(
        img_ch, Ax,
        dimension_numbers=(((1,), (0,)), ((), ())),
        preferred_element_type=jnp.float32)                # (C*H, P)
    G = G.reshape(C, H, P)                                 # tile-aligned sublane split

    # VPU multiply + sublane (XLU) reduction over the source-row axis.
    out = jnp.sum(G * Ay[None, :, :], axis=1)              # (C, P)
    out_ref[0] = out.astype(out_ref.dtype)


def transformation_2d(img, matrix_2d):
    """img: (N, C, H, W) f32, matrix_2d: (N, 2, 3) f32 -> (N, C, H, W) f32."""
    img = img.astype(jnp.float32)
    theta = matrix_2d.astype(jnp.float32).reshape(-1)      # flat (N*6,) scalars for SMEM
    N, C, H, W = img.shape
    P = H * W

    # Base sampling grid (align_corners=False): x_j = -1 + (2j+1)/W, etc.
    xs = -1.0 + (2.0 * jnp.arange(W, dtype=jnp.float32) + 1.0) / W
    ys = -1.0 + (2.0 * jnp.arange(H, dtype=jnp.float32) + 1.0) / H
    base_x = jnp.tile(xs, H).reshape(1, P)      # p = h*W + w -> xs[w]
    base_y = jnp.repeat(ys, W).reshape(1, P)    # p = h*W + w -> ys[h]

    img_rows = img.reshape(N, C * H, W)         # channels folded onto sublane axis
    kernel = functools.partial(_stn_kernel, H=H, W=W, C=C)

    out_flat = pl.pallas_call(
        kernel,
        out_shape=jax.ShapeDtypeStruct((N, C, P), jnp.float32),
        grid=(N,),
        in_specs=[
            # whole flattened theta in SMEM; kernel indexes it with program_id
            pl.BlockSpec(memory_space=pltpu.MemorySpace.SMEM),
            pl.BlockSpec((1, P), lambda n: (0, 0)),
            pl.BlockSpec((1, P), lambda n: (0, 0)),
            pl.BlockSpec((1, C * H, W), lambda n: (n, 0, 0)),
        ],
        out_specs=pl.BlockSpec((1, C, P), lambda n: (n, 0, 0)),
        compiler_params=pltpu.CompilerParams(
            dimension_semantics=("parallel",)),
    )(theta, base_x, base_y, img_rows)

    return out_flat.reshape(N, C, H, W)


def stn_reference(img, theta):
    """Pure-JAX reference of affine_grid + grid_sample (bilinear, zeros, ac=False)."""
    N, C, H, W = img.shape
    xs = -1.0 + (2.0 * jnp.arange(W, dtype=jnp.float32) + 1.0) / W
    ys = -1.0 + (2.0 * jnp.arange(H, dtype=jnp.float32) + 1.0) / H
    xb = jnp.broadcast_to(xs[None, :], (H, W))
    yb = jnp.broadcast_to(ys[:, None], (H, W))
    t = theta.astype(jnp.float32)
    gx = t[:, 0, 0, None, None] * xb + t[:, 0, 1, None, None] * yb + t[:, 0, 2, None, None]
    gy = t[:, 1, 0, None, None] * xb + t[:, 1, 1, None, None] * yb + t[:, 1, 2, None, None]
    ix = ((gx + 1.0) * W - 1.0) * 0.5
    iy = ((gy + 1.0) * H - 1.0) * 0.5
    ix0 = jnp.floor(ix); iy0 = jnp.floor(iy)
    ix1 = ix0 + 1.0;     iy1 = iy0 + 1.0
    wx1 = ix - ix0; wx0 = 1.0 - wx1
    wy1 = iy - iy0; wy0 = 1.0 - wy1
    nidx = jnp.arange(N)[:, None, None, None]
    cidx = jnp.arange(C)[None, :, None, None]

    def gather(iyc, ixc, w):
        valid = (ixc >= 0) & (ixc < W) & (iyc >= 0) & (iyc < H)
        xi = jnp.clip(ixc, 0, W - 1).astype(jnp.int32)[:, None]
        yi = jnp.clip(iyc, 0, H - 1).astype(jnp.int32)[:, None]
        vals = img[nidx, cidx, yi, xi]
        return vals * (w * valid)[:, None]

    return (gather(iy0, ix0, wy0 * wx0) + gather(iy0, ix1, wy0 * wx1) +
            gather(iy1, ix0, wy1 * wx0) + gather(iy1, ix1, wy1 * wx1))


if __name__ == "__main__":
    key = jax.random.PRNGKey(0)
    k_img, _ = jax.random.split(key)

    # img: (N=2, C=4, H=16, W=16); matrix_2D: (N=2, 2, 3) affine params
    img = jax.random.normal(k_img, (2, 4, 16, 16), dtype=jnp.float32)
    ang = jnp.array([0.3, -0.5], dtype=jnp.float32)
    sc = jnp.array([1.1, 0.9], dtype=jnp.float32)
    tx = jnp.array([0.1, -0.2], dtype=jnp.float32)
    ty = jnp.array([-0.15, 0.05], dtype=jnp.float32)
    row0 = jnp.stack([sc * jnp.cos(ang), -sc * jnp.sin(ang), tx], axis=-1)
    row1 = jnp.stack([sc * jnp.sin(ang), sc * jnp.cos(ang), ty], axis=-1)
    theta = jnp.stack([row0, row1], axis=1)  # (2, 2, 3)

    out = transformation_2d(img, theta)
    out = jax.block_until_ready(out)

    ref = stn_reference(img, theta)
    err = float(jnp.max(jnp.abs(out - ref)))
    assert out.shape == img.shape and err < 1e-4, f"mismatch, max abs err = {err}"
    print("KERNEL_OK")
</pallas_src>

<mosaic_0001>
module attributes {stable_mosaic.version = 11 : i64} {
  func.func @_stn_kernel(%arg0: i32, %arg1: memref<12xf32, #tpu.memory_space<smem>>, %arg2: memref<1x256xf32, #tpu.memory_space<vmem>>, %arg3: memref<1x256xf32, #tpu.memory_space<vmem>>, %arg4: memref<1x64x16xf32, #tpu.memory_space<vmem>>, %arg5: memref<1x4x256xf32, #tpu.memory_space<vmem>>) attributes {dimension_semantics = [#tpu.dimension_semantics<parallel>], iteration_bounds = array<i64: 2>, scalar_prefetch = 0 : i64, scratch_operands = 0 : i64, tpu.core_type = #tpu.core_type<tc>, window_params = [{transform_indices = @transform_0, window_bounds = array<i64: 12>}, {pipeline_mode = #tpu.pipeline_mode<synchronous>, transform_indices = @transform_1, window_bounds = array<i64: 1, 256>}, {pipeline_mode = #tpu.pipeline_mode<synchronous>, transform_indices = @transform_2, window_bounds = array<i64: 1, 256>}, {transform_indices = @transform_3, window_bounds = array<i64: 1, 64, 16>}, {transform_indices = @transform_4, window_bounds = array<i64: 1, 4, 256>}]} {
    %c6_i32 = arith.constant 6 : i32
    %0 = arith.muli %c6_i32, %arg0 : i32
    %c0_i32 = arith.constant 0 : i32
    %1 = arith.addi %0, %c0_i32 : i32
    %2 = arith.index_cast %1 : i32 to index
    %3 = memref.load %arg1[%2] : memref<12xf32, #tpu.memory_space<smem>>
    %c6_i32_0 = arith.constant 6 : i32
    %4 = arith.muli %c6_i32_0, %arg0 : i32
    %c1_i32 = arith.constant 1 : i32
    %5 = arith.addi %4, %c1_i32 : i32
    %6 = arith.index_cast %5 : i32 to index
    %7 = memref.load %arg1[%6] : memref<12xf32, #tpu.memory_space<smem>>
    %c6_i32_1 = arith.constant 6 : i32
    %8 = arith.muli %c6_i32_1, %arg0 : i32
    %c2_i32 = arith.constant 2 : i32
    %9 = arith.addi %8, %c2_i32 : i32
    %10 = arith.index_cast %9 : i32 to index
    %11 = memref.load %arg1[%10] : memref<12xf32, #tpu.memory_space<smem>>
    %c6_i32_2 = arith.constant 6 : i32
    %12 = arith.muli %c6_i32_2, %arg0 : i32
    %c3_i32 = arith.constant 3 : i32
    %13 = arith.addi %12, %c3_i32 : i32
    %14 = arith.index_cast %13 : i32 to index
    %15 = memref.load %arg1[%14] : memref<12xf32, #tpu.memory_space<smem>>
    %c6_i32_3 = arith.constant 6 : i32
    %16 = arith.muli %c6_i32_3, %arg0 : i32
    %c4_i32 = arith.constant 4 : i32
    %17 = arith.addi %16, %c4_i32 : i32
    %18 = arith.index_cast %17 : i32 to index
    %19 = memref.load %arg1[%18] : memref<12xf32, #tpu.memory_space<smem>>
    %c6_i32_4 = arith.constant 6 : i32
    %20 = arith.muli %c6_i32_4, %arg0 : i32
    %c5_i32 = arith.constant 5 : i32
    %21 = arith.addi %20, %c5_i32 : i32
    %22 = arith.index_cast %21 : i32 to index
    %23 = memref.load %arg1[%22] : memref<12xf32, #tpu.memory_space<smem>>
    %c0 = arith.constant 0 : index
    %c0_5 = arith.constant 0 : index
    %24 = vector.load %arg2[%c0, %c0_5] : memref<1x256xf32, #tpu.memory_space<vmem>>, vector<1x256xf32>
    %c0_6 = arith.constant 0 : index
    %c0_7 = arith.constant 0 : index
    %25 = vector.load %arg3[%c0_6, %c0_7] : memref<1x256xf32, #tpu.memory_space<vmem>>, vector<1x256xf32>
    %26 = vector.broadcast %3 : f32 to vector<1x256xf32>
    %27 = arith.mulf %26, %24 : vector<1x256xf32>
    %28 = vector.broadcast %7 : f32 to vector<1x256xf32>
    %29 = arith.mulf %28, %25 : vector<1x256xf32>
    %30 = arith.addf %27, %29 : vector<1x256xf32>
    %31 = vector.broadcast %11 : f32 to vector<1x256xf32>
    %32 = arith.addf %30, %31 : vector<1x256xf32>
    %33 = vector.broadcast %15 : f32 to vector<1x256xf32>
    %34 = arith.mulf %33, %24 : vector<1x256xf32>
    %35 = vector.broadcast %19 : f32 to vector<1x256xf32>
    %36 = arith.mulf %35, %25 : vector<1x256xf32>
    %37 = arith.addf %34, %36 : vector<1x256xf32>
    %38 = vector.broadcast %23 : f32 to vector<1x256xf32>
    %39 = arith.addf %37, %38 : vector<1x256xf32>
    %cst = arith.constant 1.000000e+00 : f32
    %40 = vector.broadcast %cst : f32 to vector<1x256xf32>
    %41 = arith.addf %32, %40 : vector<1x256xf32>
    %cst_8 = arith.constant 1.600000e+01 : f32
    %42 = vector.broadcast %cst_8 : f32 to vector<1x256xf32>
    %43 = arith.mulf %41, %42 : vector<1x256xf32>
    %cst_9 = arith.constant 1.000000e+00 : f32
    %44 = vector.broadcast %cst_9 : f32 to vector<1x256xf32>
    %45 = arith.subf %43, %44 : vector<1x256xf32>
    %cst_10 = arith.constant 5.000000e-01 : f32
    %46 = vector.broadcast %cst_10 : f32 to vector<1x256xf32>
    %47 = arith.mulf %45, %46 : vector<1x256xf32>
    %cst_11 = arith.constant 1.000000e+00 : f32
    %48 = vector.broadcast %cst_11 : f32 to vector<1x256xf32>
    %49 = arith.addf %39, %48 : vector<1x256xf32>
    %cst_12 = arith.constant 1.600000e+01 : f32
    %50 = vector.broadcast %cst_12 : f32 to vector<1x256xf32>
    %51 = arith.mulf %49, %50 : vector<1x256xf32>
    %cst_13 = arith.constant 1.000000e+00 : f32
    %52 = vector.broadcast %cst_13 : f32 to vector<1x256xf32>
    %53 = arith.subf %51, %52 : vector<1x256xf32>
    %cst_14 = arith.constant 5.000000e-01 : f32
    %54 = vector.broadcast %cst_14 : f32 to vector<1x256xf32>
    %55 = arith.mulf %53, %54 : vector<1x256xf32>
    %56 = math.floor %47 : vector<1x256xf32>
    %57 = math.floor %55 : vector<1x256xf32>
    %cst_15 = arith.constant 1.000000e+00 : f32
    %58 = vector.broadcast %cst_15 : f32 to vector<1x256xf32>
    %59 = arith.addf %56, %58 : vector<1x256xf32>
    %cst_16 = arith.constant 1.000000e+00 : f32
    %60 = vector.broadcast %cst_16 : f32 to vector<1x256xf32>
    %61 = arith.addf %57, %60 : vector<1x256xf32>
    %62 = arith.subf %47, %56 : vector<1x256xf32>
    %cst_17 = arith.constant 1.000000e+00 : f32
    %63 = vector.broadcast %cst_17 : f32 to vector<1x256xf32>
    %64 = arith.subf %63, %62 : vector<1x256xf32>
    %65 = arith.subf %55, %57 : vector<1x256xf32>
    %cst_18 = arith.constant 1.000000e+00 : f32
    %66 = vector.broadcast %cst_18 : f32 to vector<1x256xf32>
    %67 = arith.subf %66, %65 : vector<1x256xf32>
    %68 = tpu.iota {dimensions = array<i32: 0>} : vector<16x256xi32>
    %69 = tpu.iota {dimensions = array<i32: 0>} : vector<16x256xi32>
    %cst_19 = arith.constant 0.000000e+00 : f32
    %70 = vector.broadcast %cst_19 : f32 to vector<1x256xf32>
    %71 = arith.cmpf oge, %56, %70 : vector<1x256xf32>
    %cst_20 = arith.constant 1.600000e+01 : f32
    %72 = vector.broadcast %cst_20 : f32 to vector<1x256xf32>
    %73 = arith.cmpf olt, %56, %72 : vector<1x256xf32>
    %74 = arith.andi %71, %73 : vector<1x256xi1>
    %cst_21 = arith.constant 0.000000e+00 : f32
    %75 = vector.broadcast %cst_21 : f32 to vector<1x256xf32>
    %76 = arith.select %74, %64, %75 : vector<1x256xi1>, vector<1x256xf32>
    %77 = arith.fptosi %56 : vector<1x256xf32> to vector<1x256xi32>
    %78 = vector.broadcast %77 : vector<1x256xi32> to vector<16x256xi32>
    %79 = arith.cmpi eq, %68, %78 : vector<16x256xi32>
    %cst_22 = arith.constant 0.000000e+00 : f32
    %80 = vector.shape_cast %76 : vector<1x256xf32> to vector<1x256xf32>
    %81 = vector.broadcast %80 : vector<1x256xf32> to vector<16x256xf32>
    %82 = vector.broadcast %cst_22 : f32 to vector<16x256xf32>
    %83 = arith.select %79, %81, %82 : vector<16x256xi1>, vector<16x256xf32>
    %cst_23 = arith.constant 0.000000e+00 : f32
    %84 = vector.broadcast %cst_23 : f32 to vector<1x256xf32>
    %85 = arith.cmpf oge, %59, %84 : vector<1x256xf32>
    %cst_24 = arith.constant 1.600000e+01 : f32
    %86 = vector.broadcast %cst_24 : f32 to vector<1x256xf32>
    %87 = arith.cmpf olt, %59, %86 : vector<1x256xf32>
    %88 = arith.andi %85, %87 : vector<1x256xi1>
    %cst_25 = arith.constant 0.000000e+00 : f32
    %89 = vector.broadcast %cst_25 : f32 to vector<1x256xf32>
    %90 = arith.select %88, %62, %89 : vector<1x256xi1>, vector<1x256xf32>
    %91 = arith.fptosi %59 : vector<1x256xf32> to vector<1x256xi32>
    %92 = vector.broadcast %91 : vector<1x256xi32> to vector<16x256xi32>
    %93 = arith.cmpi eq, %68, %92 : vector<16x256xi32>
    %cst_26 = arith.constant 0.000000e+00 : f32
    %94 = vector.shape_cast %90 : vector<1x256xf32> to vector<1x256xf32>
    %95 = vector.broadcast %94 : vector<1x256xf32> to vector<16x256xf32>
    %96 = vector.broadcast %cst_26 : f32 to vector<16x256xf32>
    %97 = arith.select %93, %95, %96 : vector<16x256xi1>, vector<16x256xf32>
    %98 = arith.addf %83, %97 : vector<16x256xf32>
    %cst_27 = arith.constant 0.000000e+00 : f32
    %99 = vector.broadcast %cst_27 : f32 to vector<1x256xf32>
    %100 = arith.cmpf oge, %57, %99 : vector<1x256xf32>
    %cst_28 = arith.constant 1.600000e+01 : f32
    %101 = vector.broadcast %cst_28 : f32 to vector<1x256xf32>
    %102 = arith.cmpf olt, %57, %101 : vector<1x256xf32>
    %103 = arith.andi %100, %102 : vector<1x256xi1>
    %cst_29 = arith.constant 0.000000e+00 : f32
    %104 = vector.broadcast %cst_29 : f32 to vector<1x256xf32>
    %105 = arith.select %103, %67, %104 : vector<1x256xi1>, vector<1x256xf32>
    %106 = arith.fptosi %57 : vector<1x256xf32> to vector<1x256xi32>
    %107 = vector.broadcast %106 : vector<1x256xi32> to vector<16x256xi32>
    %108 = arith.cmpi eq, %69, %107 : vector<16x256xi32>
    %cst_30 = arith.constant 0.000000e+00 : f32
    %109 = vector.shape_cast %105 : vector<1x256xf32> to vector<1x256xf32>
    %110 = vector.broadcast %109 : vector<1x256xf32> to vector<16x256xf32>
    %111 = vector.broadcast %cst_30 : f32 to vector<16x256xf32>
    %112 = arith.select %108, %110, %111 : vector<16x256xi1>, vector<16x256xf32>
    %cst_31 = arith.constant 0.000000e+00 : f32
    %113 = vector.broadcast %cst_31 : f32 to vector<1x256xf32>
    %114 = arith.cmpf oge, %61, %113 : vector<1x256xf32>
    %cst_32 = arith.constant 1.600000e+01 : f32
    %115 = vector.broadcast %cst_32 : f32 to vector<1x256xf32>
    %116 = arith.cmpf olt, %61, %115 : vector<1x256xf32>
    %117 = arith.andi %114, %116 : vector<1x256xi1>
    %cst_33 = arith.constant 0.000000e+00 : f32
    %118 = vector.broadcast %cst_33 : f32 to vector<1x256xf32>
    %119 = arith.select %117, %65, %118 : vector<1x256xi1>, vector<1x256xf32>
    %120 = arith.fptosi %61 : vector<1x256xf32> to vector<1x256xi32>
    %121 = vector.broadcast %120 : vector<1x256xi32> to vector<16x256xi32>
    %122 = arith.cmpi eq, %69, %121 : vector<16x256xi32>
    %cst_34 = arith.constant 0.000000e+00 : f32
    %123 = vector.shape_cast %119 : vector<1x256xf32> to vector<1x256xf32>
    %124 = vector.broadcast %123 : vector<1x256xf32> to vector<16x256xf32>
    %125 = vector.broadcast %cst_34 : f32 to vector<16x256xf32>
    %126 = arith.select %122, %124, %125 : vector<16x256xi1>, vector<16x256xf32>
    %127 = arith.addf %112, %126 : vector<16x256xf32>
    %c0_35 = arith.constant 0 : index
    %c0_36 = arith.constant 0 : index
    %c0_37 = arith.constant 0 : index
    %128 = vector.load %arg4[%c0_35, %c0_36, %c0_37] : memref<1x64x16xf32, #tpu.memory_space<vmem>>, vector<1x64x16xf32>
    %129 = vector.shape_cast %128 : vector<1x64x16xf32> to vector<64x16xf32>
    %cst_38 = arith.constant dense<0.000000e+00> : vector<64x256xf32>
    %130 = tpu.matmul %129, %98, %cst_38 {dimension_numbers = #tpu.dot_dimension_numbers<[1], [0], [0], [1], [0, 0, 1, 1], [], []>} : vector<64x16xf32>, vector<16x256xf32>, vector<64x256xf32> -> vector<64x256xf32>
    %131 = vector.shape_cast %130 : vector<64x256xf32> to vector<4x16x256xf32>
    %132 = vector.shape_cast %127 : vector<16x256xf32> to vector<1x16x256xf32>
    %133 = vector.broadcast %132 : vector<1x16x256xf32> to vector<4x16x256xf32>
    %134 = arith.mulf %131, %133 : vector<4x16x256xf32>
    %cst_39 = arith.constant dense<0.000000e+00> : vector<4x256xf32>
    %135 = vector.multi_reduction <add>, %134, %cst_39 [1] : vector<4x16x256xf32> to vector<4x256xf32>
    %c0_40 = arith.constant 0 : index
    %c0_41 = arith.constant 0 : index
    %c0_42 = arith.constant 0 : index
    %136 = vector.load %arg5[%c0_40, %c0_41, %c0_42] : memref<1x4x256xf32, #tpu.memory_space<vmem>>, vector<1x4x256xf32>
    %137 = vector.shape_cast %136 : vector<1x4x256xf32> to vector<4x256xf32>
    %138 = vector.shape_cast %135 : vector<4x256xf32> to vector<1x4x256xf32>
    tpu.vector_store %arg5[%c0_40, %c0_41, %c0_42], %138 {strides = array<i32>} : memref<1x4x256xf32, #tpu.memory_space<vmem>>, vector<1x4x256xf32>,
    return
  }
  func.func @transform_0(%arg0: i32) -> i32 {
    %c0_i32 = arith.constant 0 : i32
    %c0_i32_0 = arith.constant 0 : i32
    return %c0_i32 : i32
  }
  func.func @transform_1(%arg0: i32) -> (i32, i32) {
    %c0_i32 = arith.constant 0 : i32
    %c0_i32_0 = arith.constant 0 : i32
    %c0_i32_1 = arith.constant 0 : i32
    return %c0_i32, %c0_i32_0 : i32, i32
  }
  func.func @transform_2(%arg0: i32) -> (i32, i32) {
    %c0_i32 = arith.constant 0 : i32
    %c0_i32_0 = arith.constant 0 : i32
    %c0_i32_1 = arith.constant 0 : i32
    return %c0_i32, %c0_i32_0 : i32, i32
  }
  func.func @transform_3(%arg0: i32) -> (i32, i32, i32) {
    %c0_i32 = arith.constant 0 : i32
    %c0_i32_0 = arith.constant 0 : i32
    %c0_i32_1 = arith.constant 0 : i32
    return %arg0, %c0_i32, %c0_i32_0 : i32, i32, i32
  }
  func.func @transform_4(%arg0: i32) -> (i32, i32, i32) {
    %c0_i32 = arith.constant 0 : i32
    %c0_i32_0 = arith.constant 0 : i32
    %c0_i32_1 = arith.constant 0 : i32
    return %arg0, %c0_i32, %c0_i32_0 : i32, i32, i32
  }
}

</mosaic_0001>

<bundles_post_ra>
// kernel: tpu_custom_call.1
= control target key start
LH: loop header
LB: loop body
LE: loop exit
PB: predicated region body
PF: predicated region fallthrough
CT: control target
= control target key end

     0   :  { %9 = vsyncpa [#allocation4], 0  ;;  %s1126_s0 = inlined_call_operand.vmem [shape: f32[12], index: 0, kind: input, shape index: {}]   ;;  %s1127_s1 = inlined_call_operand.vmem [shape: f32[1,256], index: 1, kind: input, shape index: {}]   ;;  %s1128_s2 = inlined_call_operand.vmem [shape: f32[1,256], index: 2, kind: input, shape index: {}]   ;;  %s1129_s3 = inlined_call_operand.vmem [shape: f32[2,64,16], index: 3, kind: input, shape index: {}]   ;;  %s1130_s4 = inlined_call_operand.hbm [shape: f32[2,4,256], index: 4, kind: output, shape index: {}]  }
   0x1   :  { %10 = vsyncpa [#allocation3], 0 }
   0x2   :  { %12 = vsyncpa [#allocation3 + $0x1], 0  ;;  %s928_s15 = smov 0   ;;  %s930_s16 = smov 0  }
   0x3   :  { %s932_s17 = smov 0   ;;  %s934_s18 = smov 0  }
   0x4 LB: > { %s949_s19 = sadd.s32 4294967295, %s898_s18   ;;  %s726_s20 = sadd.s32 4294967294, %s898_s18   ;;  %s898_s18 = sphi %s934_s18, %s1137_s18   ;;  %s894_s17 = sphi %s932_s17, %s1136_s17   ;;  %s890_s16 = sphi %s930_s16, %s1135_s16   ;;  %s886_s15 = sphi %s928_s15, %s1134_s15  }
   0x5   : > { %s953_s21 = sadd.s32 1, %s898_s18   ;;  %s114_s22 = sadd.s32 1, %s894_s17 }
   0x6   : > { %s111_s23 = ssub.s32 %s898_s18, %s953_s21  ;;  %p124_p0 = scmp.ne.s32.totalorder %s894_s17, %s890_s16 }
   0x7   : > { %p112_p1 = scmp.eq.s32.totalorder %s111_s23, 0  ;;  %p125_p2 = scmp.eq.s32.totalorder %s949_s19, 1 }
   0x8   : > { %p130_p3 = scmp.ne.s32.totalorder %s890_s16, %s886_s15  ;;  %p131_p4 = scmp.eq.s32.totalorder %s726_s20, 1 }
   0x9   : > { %s964_s24 = scalar_select %p112_p1, %s894_s17, %s114_s22  }
   0xa   : > { %p966_p5 = por %p125_p2, %p124_p0  ;;  %p970_p6 = por %p131_p4, %p130_p3 }
   0xb   : > { %p727_p7 = scmp.ge.s32.totalorder %s898_s18, 1  ;;  %p138_p8 = scmp.lt.s32.totalorder %s898_s18, 3 }
   0xc   : > { %p780_p9 = scmp.eq.s32.totalorder %s949_s19, 0  ;;  %s151_s30 = sshll.u32 %s1126_s0, 4  ;;  %s152_s30 = int_to_ptr.vmem [resolvable:$true] %s151_s30 }
   0xd   : > { %p977_p10 = pnand %p727_p7, %p138_p8  ;;  %s817_s5 = scalar_lea.vmem %s152_s30, 16 }
   0xe   : > { %p818_p13 = scmp.ne.s32.totalorder %s152_s30, %s817_s5  ;;  %p825_p3 = scmp.lt.s32.totalorder %s152_s30, %s152_s30 }
   0xf   : > { %p772_p11 = pneg %p977_p10  ;;  %p826_p4 = scmp.lt.s32.totalorder %s817_s5, %s817_s5 }
  0x11   : > { %p773_p12 = pnand %p780_p9, %p772_p11  ;;  %p827_p7 = por %p826_p4, %p825_p3 }
  0x13   : > { %p819_p0 = pneg %p773_p12 }
  0x15   : > { %p820_p1 = pnand %p819_p0, %p818_p13 }
  0x17   : > { %p821_p2 = pneg %p820_p1 }
  0x19   : > { %p828_p8 = pnand %p827_p7, %p821_p2 }
  0x1b   : > { %831 = shalt.err (!%p828_p8)
}
  0x1c   : > { %s900_s6 = smov [#allocation2]   ;;  %178 = sbr.rel (%p977_p10) target bundleno = 348 (0x15c), region = 36 }
  0x1d   : > { %775 = dma.vmem_to_smem (!%p773_p12), %s152_s30, 16, %s900_s6, [#allocation4]  }
  0x23   : > { %877 = dma.done.wait (%p780_p9), [#allocation4], 16  }
  0x24   : > { %879 = vsyncadd (%p780_p9), [#allocation4], 4294967280 }
  0x25   : > { %184 = sfence }
  0x26   : > { %s210_s7 = smul.u32 6, %s949_s19  ;;  %v901_v0 = vmov 0.0   ;;  %v222_v1 = vld [vmem:[%s1127_s1] sm:$0x3]  ;;  %v254_v19 = vlaneseq  ;;  %p205_p9 = scmp.lt.s32.totalorder %s949_s19, 1 }
  0x27   : > { %490 = vmatprep.mubr.f32.mxu0 %v901_v0  ;;  %514 = vmatprep.mubr.f32.mxu1 %v901_v0  ;;  %v223_v2 = vld [vmem:[%s1128_s2] sm:$0x3]  ;;  %s902_s29 = smov [#allocation5]  }
  0x28   : > { %s211_s8 = sld [smem:[#allocation2 + %s210_s7]]  ;;  %s212_s9 = sadd.s32 1, %s210_s7  ;;  %v1003_v24 = vshrl.u32 %v254_v19, 7 }
  0x29   : > { %s213_s10 = sld [smem:[#allocation2 + %s212_s9]]  ;;  %s214_s11 = sadd.s32 2, %s210_s7 }
  0x2a   : > { %s215_s12 = sld [smem:[#allocation2 + %s214_s11]]  ;;  %s216_s13 = sadd.s32 3, %s210_s7  ;;  %v1006_v27 = vadd.s32 8, %v1003_v24  ;;  %v1009_v32 = vsub.s32 1, %v1003_v24  ;;  %v1012_v33 = vsub.s32 0, %v1003_v24 }
  0x2b   : > { %s217_s14 = sld [smem:[#allocation2 + %s216_s13]]  ;;  %s218_s20 = sadd.s32 4, %s210_s7 }
  0x2c   : > { %s219_s22 = sld [smem:[#allocation2 + %s218_s20]]  ;;  %s220_s28 = sadd.s32 5, %s210_s7 }
  0x2d   : > { %s221_s5 = sld [smem:[#allocation2 + %s220_s28]]  ;;  %s202_s11 = sand.u32 1, %s890_s16  }
  0x2e   : > { %v224_v3 = vstv %s211_s8  ;;  %s206_s6 = scalar_select %p205_p9, %s949_s19, 1 }
  0x2f   : > { %v225_v4 = vmul.f32 %v224_v3, %v222_v1  ;;  %v226_v5 = vstv %s213_s10  ;;  %s751_s13 = sshll.u32 %s949_s19, 7  ;;  %s641_s19 = scalar_lea.sflag [#allocation3], %s202_s11 }
  0x30   : > { %v227_v6 = vmul.f32 %v226_v5, %v223_v2  ;;  %v229_v7 = vstv %s215_s12  ;;  %s750_s7 = sshll.u32 %s206_s6, 6  ;;  %s732_s12 = sshll.u32 %s202_s11, 3 }
  0x31   : > { %v231_v8 = vstv %s217_s14  ;;  %s1039_s10 = scalar_lea.vmem %s1129_s3, %s750_s7  ;;  %s204_s14 = scalar_lea.vmem [#allocation5], %s732_s12 }
  0x32   : > { %v228_v9 = vadd.f32 %v227_v6, %v225_v4  ;;  %v232_v10 = vmul.f32 %v231_v8, %v222_v1  ;;  %v233_v11 = vstv %s219_s22  ;;  %s655_s20 = sshll.u32 %s204_s14, 4  ;;  %s1084_s27 = scalar_lea.hbm %s1130_s4, %s751_s13  ;;  %s1086_s20 = int_to_ptr.vmem [resolvable:$true] %s655_s20 }
  0x33   : > { %v234_v12 = vmul.f32 %v233_v11, %v223_v2  ;;  %v236_v14 = vstv %s221_s5  ;;  %v393_v11 = vld [vmem:[%s1039_s10] sm:$0xff]  ;;  %s832_s28 = scalar_lea.vmem %s1086_s20, 128  ;;  %s836_s30 = sshll.u32 %s902_s29, 4  ;;  %s837_s30 = int_to_ptr.vmem [resolvable:$false] %s836_s30 }
  0x34   : > { %v230_v13 = vadd.f32 %v229_v7, %v228_v9  ;;  %p833_p10 = scmp.ne.s32.totalorder %s1086_s20, %s832_s28  ;;  %s838_s5 = scalar_lea.vmem %s837_s30, 256 }
  0x35   : > { %v235_v15 = vadd.f32 %v234_v12, %v232_v10  ;;  %v397_v12 = vld [vmem:[%s1039_s10 + $0x20] sm:$0xff]  ;;  %p839_p13 = scmp.lt.s32.totalorder %s1086_s20, %s837_s30  ;;  %p840_p0 = scmp.lt.s32.totalorder %s838_s5, %s832_s28 }
  0x36   : > { %v238_v16 = vadd.f32 1.0, %v230_v13  ;;  %p834_p11 = pnand %p833_p10, %p966_p5 }
  0x37   : > { %v237_v17 = vadd.f32 %v236_v14, %v235_v15  ;;  %p841_p1 = por %p840_p0, %p839_p13 }
  0x38   : > { %v239_v18 = vmul.f32 16.0, %v238_v16  ;;  %v394_v16 = vld [vmem:[%s1039_s10 + $0x8] sm:$0xff]  ;;  %p835_p12 = pneg %p834_p11 }
  0x39   : > { %v242_v20 = vadd.f32 1.0, %v237_v17  ;;  %v398_v17 = vld [vmem:[%s1039_s10 + $0x28] sm:$0xff] }
  0x3a   : > { %v735_v21 = vadd.f32 -1.0, %v239_v18  ;;  %p842_p2 = pnand %p841_p1, %p835_p12 }
  0x3b   : > { %v243_v22 = vmul.f32 16.0, %v242_v20  ;;  %v395_v20 = vld [vmem:[%s1039_s10 + $0x10] sm:$0xff] }
  0x3c   : > { %v241_v23 = vmul.f32 0.5, %v735_v21  ;;  %v399_v21 = vld [vmem:[%s1039_s10 + $0x30] sm:$0xff] }
  0x3d   : > { %v736_v25 = vadd.f32 -1.0, %v243_v22  ;;  %v396_v22 = vld [vmem:[%s1039_s10 + $0x18] sm:$0xff] }
  0x3e   : > { %v246_v26 = vfloor.f32 %v241_v23 }
  0x3f   : > { %v245_v28 = vmul.f32 0.5, %v736_v25 }
  0x40   : > { %v248_v29 = vadd.f32 1.0, %v246_v26  ;;  %v250_v30 = vsub.f32 %v241_v23, %v246_v26  ;;  %vm257_vm0 = vcmp.ge.f32.partialorder %v246_v26, 0.0  ;;  %vm258_vm1 = vcmp.lt.f32.partialorder %v246_v26, 16.0  ;;  %v400_v23 = vld [vmem:[%s1039_s10 + $0x38] sm:$0xff] }
  0x41   : > { %vm259_vm2 = vmand %vm257_vm0, %vm258_vm1  ;;  %v758_v31 = vtrunc.f32 %v246_v26  ;;  %v247_v34 = vfloor.f32 %v245_v28 }
  0x42   : > { %v251_v35 = vsub.f32 1.0, %v250_v30  ;;  %vm289_vm3 = vcmp.ge.f32.partialorder %v248_v29, 0.0  ;;  %vm290_vm4 = vcmp.lt.f32.partialorder %v248_v29, 16.0  ;;  %v760_v36 = vtrunc.f32 %v248_v29 }
  0x43   : > { %v759_v37 = vcvt.f32.s32 %v758_v31  ;;  %vm291_vm5 = vmand %vm289_vm3, %vm290_vm4  ;;  %v249_v38 = vadd.f32 1.0, %v247_v34  ;;  %v252_v39 = vsub.f32 %v245_v28, %v247_v34  ;;  %vm325_vm6 = vcmp.ge.f32.partialorder %v247_v34, 0.0 }
  0x44   : > { %v260_v40 = vsel %vm259_vm2, %v251_v35, 0.0  ;;  %v292_v41 = vsel %vm291_vm5, %v250_v30, 0.0  ;;  %v761_v42 = vcvt.f32.s32 %v760_v36  ;;  %vm326_vm7 = vcmp.lt.f32.partialorder %v247_v34, 16.0 }
  0x45   : > { %v269_v43 = vrot.slane %v759_v37, %v1009_v32  ;;  %v282_v44 = vrot.slane %v260_v40, %v1009_v32  ;;  %v314_v45 = vrot.slane %v292_v41, %v1009_v32  ;;  %v265_v46 = vrot.slane %v759_v37, %v1012_v33  ;;  %vm327_vm0 = vmand %vm325_vm6, %vm326_vm7 }
  0x46   : > { %v301_v47 = vrot.slane %v761_v42, %v1009_v32  ;;  %v278_v48 = vrot.slane %v260_v40, %v1012_v33  ;;  %v297_v49 = vrot.slane %v761_v42, %v1012_v33  ;;  %v310_v50 = vrot.slane %v292_v41, %v1012_v33 }
  0x47   : > { %vm271_vm8 = vcmp.eq.s32.totalorder %v1003_v24, %v269_v43  ;;  %vm273_vm9 = vcmp.eq.s32.totalorder %v1006_v27, %v269_v43  ;;  %vm270_vm10 = vcmp.eq.s32.totalorder %v1003_v24, %v265_v46  ;;  %vm272_vm11 = vcmp.eq.s32.totalorder %v1006_v27, %v265_v46 }
  0x48   : > { %v286_v51 = vsel %vm271_vm8, %v282_v44, 0.0  ;;  %v288_v52 = vsel %vm273_vm9, %v282_v44, 0.0  ;;  %vm303_vm12 = vcmp.eq.s32.totalorder %v1003_v24, %v301_v47  ;;  %vm305_vm13 = vcmp.eq.s32.totalorder %v1006_v27, %v301_v47 }
  0x49   : > { %v318_v53 = vsel %vm303_vm12, %v314_v45, 0.0  ;;  %v320_v54 = vsel %vm305_vm13, %v314_v45, 0.0  ;;  %v285_v55 = vsel %vm270_vm10, %v278_v48, 0.0  ;;  %v287_v56 = vsel %vm272_vm11, %v278_v48, 0.0 }
  0x4a   : > { %v322_v57 = vadd.f32 %v318_v53, %v286_v51  ;;  %v324_v58 = vadd.f32 %v320_v54, %v288_v52  ;;  %vm302_vm14 = vcmp.eq.s32.totalorder %v1003_v24, %v297_v49  ;;  %vm304_vm15 = vcmp.eq.s32.totalorder %v1006_v27, %v297_v49 }
  0x4b   : > { %v317_v59 = vsel %vm302_vm14, %v310_v50, 0.0  ;;  %v319_v60 = vsel %vm304_vm15, %v310_v50, 0.0  ;;  %v253_v61 = vsub.f32 1.0, %v252_v39  ;;  %v762_v62 = vtrunc.f32 %v247_v34 }
  0x4c   : > { %v752_v63 = vpack.c.bf16 %v324_v58, %v322_v57  ;;  %v321_v1 = vadd.f32 %v317_v59, %v285_v55  ;;  %v323_v2 = vadd.f32 %v319_v60, %v287_v56  ;;  %vm357_vm1 = vcmp.ge.f32.partialorder %v249_v38, 0.0 }
  0x4d   : > { %v328_v3 = vsel %vm327_vm0, %v253_v61, 0.0  ;;  %v763_v4 = vcvt.f32.s32 %v762_v62  ;;  %vm358_vm2 = vcmp.lt.f32.partialorder %v249_v38, 16.0  ;;  %v764_v5 = vtrunc.f32 %v249_v38 }
  0x4e   : > { %753 = vmatprep.subr.bf16.mxu0 %v752_v63  ;;  %756 = vmatprep.subr.bf16.mxu1 %v752_v63  ;;  %v754_v6 = vpack.c.bf16 %v323_v2, %v321_v1  ;;  %v346_v7 = vrot.slane %v328_v3, %v1012_v33  ;;  %vm359_vm3 = vmand %vm357_vm1, %vm358_vm2  ;;  %vm401_vm4 = vcmask 130048   ;;  %v350_v31 = vrot.slane %v328_v3, %v1009_v32 }
  0x4f   : > { %v333_v8 = vrot.slane %v763_v4, %v1012_v33  ;;  %v360_v9 = vsel %vm359_vm3, %v252_v39, 0.0  ;;  %v765_v10 = vcvt.f32.s32 %v764_v5  ;;  %v337_v29 = vrot.slane %v763_v4, %v1009_v32 }
  0x50   : > { %755 = vmatpush1.bf16.msra.mxu0 %v754_v6  ;;  %757 = vmatpush1.bf16.msra.mxu1 %v754_v6  ;;  %v378_v13 = vrot.slane %v360_v9, %v1012_v33  ;;  %vm624_vm13 = vcmask 1041409   ;;  %vm626_vm14 = vcmask 1045509   ;;  %vm629_vm15 = vcmask 1042434  }
  0x51   : > { %vm338_vm5 = vcmp.eq.s32.totalorder %v1003_v24, %v333_v8  ;;  %v365_v14 = vrot.slane %v765_v10, %v1012_v33  ;;  %vm340_vm7 = vcmp.eq.s32.totalorder %v1006_v27, %v333_v8  ;;  %v369_v30 = vrot.slane %v765_v10, %v1009_v32 }
  0x52   : > { %v353_v15 = vsel %vm338_vm5, %v346_v7, 0.0  ;;  %v355_v25 = vsel %vm340_vm7, %v346_v7, 0.0  ;;  %vm339_vm9 = vcmp.eq.s32.totalorder %v1003_v24, %v337_v29  ;;  %vm341_vm11 = vcmp.eq.s32.totalorder %v1006_v27, %v337_v29 }
  0x53   : > { %737 = vmatmul.mubr.msk.f32.vlgmr.msra.gmra.mrb[0].mxu0 %vm401_vm4, %v393_v11  ;;  %741 = vmatmul.mubr.msk.f32.vlgmr.msra.gmra.mrb[0].mxu1 %vm401_vm4, %v397_v12  ;;  %vm370_vm6 = vcmp.eq.s32.totalorder %v1003_v24, %v365_v14  ;;  %vm372_vm8 = vcmp.eq.s32.totalorder %v1006_v27, %v365_v14  ;;  %vm371_vm10 = vcmp.eq.s32.totalorder %v1003_v24, %v369_v30  ;;  %v354_v33 = vsel %vm339_vm9, %v350_v31, 0.0 }
  0x54   : > { %496 = vmatprep.mubr.f32.mxu0 %v901_v0  ;;  %520 = vmatprep.mubr.f32.mxu1 %v901_v0  ;;  %v385_v18 = vsel %vm370_vm6, %v378_v13, 0.0  ;;  %v387_v26 = vsel %vm372_vm8, %v378_v13, 0.0  ;;  %vm373_vm12 = vcmp.eq.s32.totalorder %v1006_v27, %v369_v30  ;;  %v356_v36 = vsel %vm341_vm11, %v350_v31, 0.0 }
  0x55   : > { %v389_v19 = vadd.f32 %v385_v18, %v353_v15  ;;  %v391_v28 = vadd.f32 %v387_v26, %v355_v25  ;;  %vm631_vm0 = vcmask 1046534   ;;  %vm634_vm1 = vcmask 1043459  }
  0x56   : > { %vm636_vm2 = vcmask 1047559  }
  0x57   : > { %738 = vmatmul.mubr.msk.f32.gmra.mrb[2].mxu0 %vm401_vm4, %v394_v16  ;;  %742 = vmatmul.mubr.msk.f32.gmra.mrb[2].mxu1 %vm401_vm4, %v398_v17 }
  0x58   : > { %502 = vmatprep.mubr.f32.mxu0 %v901_v0  ;;  %526 = vmatprep.mubr.f32.mxu1 %v901_v0 }
  0x5b   : > { %739 = vmatmul.mubr.msk.f32.gmra.mrb[4].mxu0 %vm401_vm4, %v395_v20  ;;  %743 = vmatmul.mubr.msk.f32.gmra.mrb[4].mxu1 %vm401_vm4, %v399_v21 }
  0x5c   : > { %508 = vmatprep.mubr.f32.mxu0 %v901_v0  ;;  %532 = vmatprep.mubr.f32.mxu1 %v901_v0  ;;  %v382_v0 = vrot.slane %v360_v9, %v1009_v32 }
  0x5e   : > { %v386_v34 = vsel %vm371_vm10, %v382_v0, 0.0  ;;  %v388_v37 = vsel %vm373_vm12, %v382_v0, 0.0 }
  0x5f   : > { %740 = vmatmul.mubr.msk.f32.gmra.mrb[6].mxu0 %vm401_vm4, %v396_v22  ;;  %744 = vmatmul.mubr.msk.f32.gmra.mrb[6].mxu1 %vm401_vm4, %v400_v23  ;;  %v390_v35 = vadd.f32 %v386_v34, %v354_v33  ;;  %v392_v45 = vadd.f32 %v388_v37, %v356_v36 }
 0x126   : > { %v492_v38 = vpop.f32.mrb[0].mxu0  ;;  %v516_v39 = vpop.f32.mrb[0].mxu1 }
 0x127   : > { %v539_v40 = vmul.f32 %v492_v38, %v389_v19  ;;  %v494_v41 = vpop.f32.mrb[1].mxu0  ;;  %v547_v42 = vmul.f32 %v516_v39, %v389_v19  ;;  %v518_v43 = vpop.f32.mrb[1].mxu1 }
 0x128   : > { %v540_v32 = vmul.f32 %v494_v41, %v390_v35  ;;  %v548_v44 = vmul.f32 %v518_v43, %v390_v35 }
 0x12a   : > { %v498_v46 = vpop.f32.mrb[2].mxu0  ;;  %v522_v24 = vpop.f32.mrb[2].mxu1 }
 0x12b   : > { %v541_v47 = vmul.f32 %v498_v46, %v391_v28  ;;  %v549_v48 = vmul.f32 %v522_v24, %v391_v28  ;;  %v500_v49 = vpop.f32.mrb[3].mxu0  ;;  %v524_v50 = vpop.f32.mrb[3].mxu1 }
 0x12c   : > { %v542_v51 = vmul.f32 %v500_v49, %v392_v45  ;;  %v550_v27 = vmul.f32 %v524_v50, %v392_v45 }
 0x12d   : > { %v555_v52 = vadd.f32 %v541_v47, %v539_v40  ;;  %v583_v53 = vadd.f32 %v549_v48, %v547_v42 }
 0x12e   : > { %v562_v54 = vadd.f32 %v542_v51, %v540_v32  ;;  %v590_v55 = vadd.f32 %v550_v27, %v548_v44  ;;  %v504_v56 = vpop.f32.mrb[4].mxu0  ;;  %v528_v57 = vpop.f32.mrb[4].mxu1 }
 0x12f   : > { %v556_v58 = vrot.slane %v555_v52, 4  ;;  %v584_v59 = vrot.slane %v583_v53, 4  ;;  %v543_v60 = vmul.f32 %v504_v56, %v389_v19  ;;  %v506_v61 = vpop.f32.mrb[5].mxu0  ;;  %v551_v62 = vmul.f32 %v528_v57, %v389_v19  ;;  %v530_v63 = vpop.f32.mrb[5].mxu1 }
 0x130   : > { %v563_v1 = vrot.slane %v562_v54, 4  ;;  %v591_v2 = vrot.slane %v590_v55, 4  ;;  %v544_v3 = vmul.f32 %v506_v61, %v390_v35  ;;  %v552_v4 = vmul.f32 %v530_v63, %v390_v35 }
 0x131   : > { %v557_v5 = vadd.f32 %v556_v58, %v555_v52  ;;  %v585_v6 = vadd.f32 %v584_v59, %v583_v53 }
 0x132   : > { %v564_v7 = vadd.f32 %v563_v1, %v562_v54  ;;  %v592_v8 = vadd.f32 %v591_v2, %v590_v55  ;;  %v510_v9 = vpop.f32.mrb[6].mxu0  ;;  %v534_v10 = vpop.f32.mrb[6].mxu1 }
 0x133   : > { %v558_v11 = vrot.slane %v557_v5, 2  ;;  %v586_v12 = vrot.slane %v585_v6, 2  ;;  %v545_v13 = vmul.f32 %v510_v9, %v391_v28  ;;  %v553_v14 = vmul.f32 %v534_v10, %v391_v28  ;;  %v512_v15 = vpop.f32.mrb[7].mxu0  ;;  %v536_v16 = vpop.f32.mrb[7].mxu1 }
 0x134   : > { %v565_v17 = vrot.slane %v564_v7, 2  ;;  %v593_v18 = vrot.slane %v592_v8, 2  ;;  %v546_v19 = vmul.f32 %v512_v15, %v392_v45  ;;  %v554_v20 = vmul.f32 %v536_v16, %v392_v45 }
 0x135   : > { %v559_v21 = vadd.f32 %v558_v11, %v557_v5  ;;  %v587_v22 = vadd.f32 %v586_v12, %v585_v6  ;;  %v569_v23 = vadd.f32 %v545_v13, %v543_v60  ;;  %v597_v25 = vadd.f32 %v553_v14, %v551_v62 }
 0x136   : > { %v566_v26 = vadd.f32 %v565_v17, %v564_v7  ;;  %v594_v29 = vadd.f32 %v593_v18, %v592_v8  ;;  %v576_v30 = vadd.f32 %v546_v19, %v544_v3  ;;  %v604_v31 = vadd.f32 %v554_v20, %v552_v4 }
 0x137   : > { %v560_v0 = vrot.slane %v559_v21, 1  ;;  %v588_v33 = vrot.slane %v587_v22, 1  ;;  %v570_v34 = vrot.slane %v569_v23, 4  ;;  %v598_v35 = vrot.slane %v597_v25, 4 }
 0x138   : > { %v567_v36 = vrot.slane %v566_v26, 1  ;;  %v595_v28 = vrot.slane %v594_v29, 1  ;;  %v577_v37 = vrot.slane %v576_v30, 4  ;;  %v605_v38 = vrot.slane %v604_v31, 4 }
 0x139   : > { %v561_v39 = vadd.f32 %v560_v0, %v559_v21  ;;  %v589_v40 = vadd.f32 %v588_v33, %v587_v22  ;;  %v571_v41 = vadd.f32 %v570_v34, %v569_v23  ;;  %v599_v42 = vadd.f32 %v598_v35, %v597_v25 }
 0x13a   : > { %v568_v43 = vadd.f32 %v567_v36, %v566_v26  ;;  %v596_v32 = vadd.f32 %v595_v28, %v594_v29  ;;  %v578_v44 = vadd.f32 %v577_v37, %v576_v30  ;;  %v606_v45 = vadd.f32 %v605_v38, %v604_v31 }
 0x13b   : > { %v572_v46 = vrot.slane %v571_v41, 2  ;;  %v600_v24 = vrot.slane %v599_v42, 2 }
 0x13c   : > { %v619_v47 = vcombine.low %v561_v39, %v568_v43  ;;  %v621_v48 = vcombine.low %v589_v40, %v596_v32  ;;  %v579_v49 = vrot.slane %v578_v44, 2  ;;  %v607_v50 = vrot.slane %v606_v45, 2 }
 0x13d   : > { %v573_v51 = vadd.f32 %v572_v46, %v571_v41  ;;  %v601_v27 = vadd.f32 %v600_v24, %v599_v42 }
 0x13e   : > { %v580_v52 = vadd.f32 %v579_v49, %v578_v44  ;;  %v608_v53 = vadd.f32 %v607_v50, %v606_v45  ;;  %v628_v2 = vrot.slane %v621_v48, 6 }
 0x13f   : > { %v574_v54 = vrot.slane %v573_v51, 1  ;;  %v602_v55 = vrot.slane %v601_v27, 1 }
 0x140   : > { %v581_v56 = vrot.slane %v580_v52, 1  ;;  %v609_v57 = vrot.slane %v608_v53, 1 }
 0x141   : > { %v575_v58 = vadd.f32 %v574_v54, %v573_v51  ;;  %v603_v59 = vadd.f32 %v602_v55, %v601_v27 }
 0x142   : > { %v582_v60 = vadd.f32 %v581_v56, %v580_v52  ;;  %v610_v61 = vadd.f32 %v609_v57, %v608_v53 }
 0x144   : > { %v620_v62 = vcombine.low %v575_v58, %v582_v60  ;;  %v622_v63 = vcombine.low %v603_v59, %v610_v61 }
 0x146   : > { %v623_v1 = vrot.slane %v620_v62, 7  ;;  %v633_v6 = vrot.slane %v622_v63, 5 }
 0x148   : > { %v625_v3 = vsel %vm624_vm13, %v623_v1, %v619_v47 }
 0x149   : > { %v627_v4 = vsel %vm626_vm14, %v623_v1, %v625_v3 }
 0x14a   : > { %v630_v5 = vsel %vm629_vm15, %v628_v2, %v627_v4 }
 0x14b   : > { %v632_v7 = vsel %vm631_vm0, %v628_v2, %v630_v5 }
 0x14c   : > { %v635_v8 = vsel %vm634_vm1, %v633_v6, %v632_v7 }
 0x14d   : > { %v637_v9 = vsel %vm636_vm2, %v633_v6, %v635_v8 }
 0x14e   : > { %639 = vst [vmem:[%s204_s14] sm:$0xff] %v637_v9 }
 0x14f   : > { %845 = shalt.err (!%p842_p2)
}
 0x150   : > { %s846_s6 = scalar_lea.hbm %s1084_s27, 128  ;;  %s850_s9 = scalar_lea.hbm %s1130_s4, 256 }
 0x151   : > { %p847_p3 = scmp.ne.s32.totalorder %s1084_s27, %s846_s6  ;;  %p851_p8 = scmp.lt.u32.totalorder %s1084_s27, %s1130_s4 }
 0x152   : > { %p852_p9 = scmp.lt.u32.totalorder %s850_s9, %s846_s6  ;;  %p854_p11 = scmp.lt.u32.totalorder %s846_s6, %s1084_s27 }
 0x153   : > { %p848_p4 = pnand %p847_p3, %p966_p5 }
 0x154   : > { %p853_p10 = por %p852_p9, %p851_p8 }
 0x155   : > { %p849_p7 = pneg %p848_p4 }
 0x156   : > { %p855_p12 = por %p854_p11, %p853_p10 }
 0x158   : > { %p856_p13 = pnand %p855_p12, %p849_p7 }
 0x15a   : > { %859 = shalt.err (!%p856_p13)
}
 0x15b   : > { %770 = dma.vmem_to_hbm [thread:$0]  (%p966_p5), %s1086_s20, 128, %s1084_s27, %s641_s19  }
 0x15c PF: > { %p782_p0 = scmp.ge.s32.totalorder %s898_s18, 2  ;;  %s667_s12 = sand.u32 1, %s886_s15  }
 0x15d   : > { %s668_s13 = scalar_lea.sflag [#allocation3], %s667_s12 }
 0x15e   : > { %p777_p1 = pnand %p782_p0, %p970_p6 }
 0x160   : > { %881 = dma.done.wait (!%p777_p1), %s668_s13, 128  }
 0x161   : > { %883 = vsyncadd (!%p777_p1), %s668_s13, 4294967168  ;;  %p15_p2 = scmp.ge.s32.totalorder %s953_s21, 4   ;;  %s1134_s15 = smov %s890_s16 }
 0x162   : > { %s1135_s16 = smov %s894_s17  ;;  %s1136_s17 = smov %s964_s24 }
 0x163   : > { %s1137_s18 = smov %s953_s21  ;;  %17 = sbr.rel (!%p15_p2) target bundleno = 4 (0x4), region = 76 }
 0x16a   :  { %673 = vsyncpa [#allocation3], 1 }
 0x16b   :  { %675 = vsyncpa [#allocation3 + $0x1], 1 }
 0x16c   :  { %676 = vsyncpa [#allocation4], 1 }
 0x16d   :  { %678 = vsyncpa [#allocation4 + $0x1], 1 }

</bundles_post_ra>
